<compile_context>
chip_gen: v7x
topology: tpu7x:2x2x1
jax: 0.10.0
libtpu: 0.0.40
codegen_flags: <defaults>
</compile_context>

<pallas_src>
import math

import jax
import jax.numpy as jnp
from jax.experimental import pallas as pl
from jax.experimental.pallas import tpu as pltpu


# ------------------------------------------------------------------
# Model constants (stabilityai/stable-diffusion-2 style scheduler config)
# ------------------------------------------------------------------
LATENT_CH = 4
HIDDEN = 128                # UNet working width (padded to a full 128-lane vreg)
VAE_SCALE = 8               # spatial downsample factor
SCALING_FACTOR = 0.18215
NUM_TRAIN_TIMESTEPS = 1000
BETA_START = 0.00085
BETA_END = 0.012
PREDICTION_TYPE = "v_prediction"   # stable-diffusion-2 default


# ------------------------------------------------------------------
# Single fused Pallas kernel: whole batch, one invocation, no grid.
# ------------------------------------------------------------------
def _fused_sd_kernel(patches_ref,                  # (B*Nl, P)  bf16  token-major pixels
                     eps_ref,                      # (B*Nl, C)  f32
                     noise_ref,                    # (B*Nl, C)  f32
                     sa_ref, sb_ref,               # (B*Nl, 1)  f32 per-row DDPM scalars
                     temb_ref,                     # (B*Nl, D)  f32 timestep embedding
                     tembq_ref,                    # (B*Nl, D)  f32 temb @ w_q (precomposed)
                     ctx_ref,                      # (B, S, Dt) bf16 text context
                     w_mean_ref, w_logvar_ref,     # (P, C) bf16 each (split encoder)
                     w_in_ref, w_inq_ref,          # (C, D) bf16 each
                     w_k_ref, w_v_ref,             # (Dt, D) bf16 each
                     w_o_ref, w_out_ref,           # (D, D), (D, C) bf16
                     np_ref, tgt_ref):             # outputs: (B, C, Nl) f32
    B, C, Nl = np_ref.shape
    D = w_o_ref.shape[0]

    # ---------------- VAE encode (patchified conv-as-matmul) + sample ------
    patches = patches_ref[...]
    mean = jnp.dot(patches, w_mean_ref[...], preferred_element_type=jnp.float32)
    logvar = jnp.dot(patches, w_logvar_ref[...], preferred_element_type=jnp.float32)
    logvar = jnp.clip(logvar, -30.0, 20.0)
    latents = (mean + jnp.exp(0.5 * logvar) * eps_ref[...]) * SCALING_FACTOR   # (BN, C)

    # ---------------- DDPM add_noise + v-prediction target -----------------
    noise = noise_ref[...]
    sa = sa_ref[...]                                   # (BN, 1) broadcast over C
    sb = sb_ref[...]
    noisy = sa * latents + sb * noise                  # (BN, C)
    target = sa * noise - sb * latents                 # (BN, C)

    # ---------------- "UNet": in-proj + t-emb, cross-attn, out-proj --------
    nb = noisy.astype(jnp.bfloat16)
    x = jnp.dot(nb, w_in_ref[...], preferred_element_type=jnp.float32) + temb_ref[...]
    # Precomposed Q: (noisy @ w_in + temb) @ w_q  ==  noisy @ w_inq + temb_q
    q = jnp.dot(nb, w_inq_ref[...], preferred_element_type=jnp.float32) + tembq_ref[...]

    ctx = ctx_ref[...]                                                    # (B, S, Dt)
    k = jnp.einsum("bst,td->bsd", ctx, w_k_ref[...],
                   preferred_element_type=jnp.float32).astype(jnp.bfloat16)
    v = jnp.einsum("bst,td->bsd", ctx, w_v_ref[...],
                   preferred_element_type=jnp.float32).astype(jnp.bfloat16)

    q3 = q.astype(jnp.bfloat16).reshape(B, Nl, D)
    s = jnp.einsum("bnd,bsd->bns", q3, k,
                   preferred_element_type=jnp.float32) * (1.0 / math.sqrt(D))
    m = jnp.max(s, axis=-1, keepdims=True)
    p = jnp.exp(s - m)
    p = p * pl.reciprocal(jnp.sum(p, axis=-1, keepdims=True), approx=True)

    attn = jnp.einsum("bns,bsd->bnd", p.astype(jnp.bfloat16), v,
                      preferred_element_type=jnp.float32)                 # (B, Nl, D)
    x = x + jnp.dot(attn.reshape(B * Nl, D).astype(jnp.bfloat16), w_o_ref[...],
                    preferred_element_type=jnp.float32)                   # residual
    np_tok = jnp.dot(x.astype(jnp.bfloat16), w_out_ref[...],
                     preferred_element_type=jnp.float32)                  # (BN, C)

    # ---------------- lane-dense channel-major stores: (B, C, Nl) ----------
    # Tiny per-batch in-register 2-D transposes so the HBM store runs along
    # the Nl lane axis instead of C=4 masked lanes.
    for b in range(B):
        np_ref[b] = np_tok[b * Nl:(b + 1) * Nl, :].T
        tgt_ref[b] = target[b * Nl:(b + 1) * Nl, :].T


# ------------------------------------------------------------------
# Lightweight Stable-Diffusion-style pipeline
# ------------------------------------------------------------------
class Text2ImageSDPipelinePallas:

    def __init__(self, in_ch=3, text_dim=32, key=jax.random.PRNGKey(0)):
        self.in_ch = in_ch
        self.text_dim = text_dim
        P = in_ch * VAE_SCALE * VAE_SCALE     # VAE patch size
        C = LATENT_CH
        D = HIDDEN
        ks = jax.random.split(key, 8)

        def init_f32(k, shape, fan_in):
            return jax.random.normal(k, shape, jnp.float32) * (1.0 / math.sqrt(fan_in))

        # "VAE encoder": strided-conv equivalent producing mean+logvar,
        # split into two weight halves so the kernel never slices at a
        # non-aligned lane offset.  (Dead zero bias dropped.)
        w_enc = init_f32(ks[0], (P, 2 * C), P)
        self.w_mean = w_enc[:, :C].astype(jnp.bfloat16)
        self.w_logvar = w_enc[:, C:].astype(jnp.bfloat16)

        # "UNet": token in-proj, cross-attention, out-proj.
        w_in = init_f32(ks[1], (C, D), C)
        w_q = init_f32(ks[2], (D, D), D)
        self._w_q_f32 = w_q                                   # for temb @ w_q
        self.w_in = w_in.astype(jnp.bfloat16)
        self.w_inq = (w_in @ w_q).astype(jnp.bfloat16)        # precomposed in-proj+Q
        self.w_k = init_f32(ks[3], (text_dim, D), text_dim).astype(jnp.bfloat16)
        self.w_v = init_f32(ks[4], (text_dim, D), text_dim).astype(jnp.bfloat16)
        self.w_o = init_f32(ks[5], (D, D), D).astype(jnp.bfloat16)
        self.w_out = init_f32(ks[6], (D, C), D).astype(jnp.bfloat16)

        # DDPM scaled_linear betas / alphas_cumprod (f32).
        betas = jnp.linspace(BETA_START ** 0.5, BETA_END ** 0.5,
                             NUM_TRAIN_TIMESTEPS, dtype=jnp.float32) ** 2
        self.alphas_cumprod = jnp.cumprod(1.0 - betas)

    # ---------------------------------------------------------------
    @staticmethod
    def _timestep_embedding(timesteps):
        D = HIDDEN
        half = D // 2
        freqs = jnp.exp(-math.log(10000.0) *
                        jnp.arange(half, dtype=jnp.float32) / half)
        args = timesteps.astype(jnp.float32)[:, None] * freqs[None, :]
        return jnp.concatenate([jnp.sin(args), jnp.cos(args)], axis=-1)   # [B, D]

    # ---------------------------------------------------------------
    def _fused_call(self, patches, eps, noise, sa, sb, temb_rep, tembq_rep,
                    ctx, B, Nl):
        C = LATENT_CH
        out_shape = (jax.ShapeDtypeStruct((B, C, Nl), jnp.float32),
                     jax.ShapeDtypeStruct((B, C, Nl), jnp.float32))
        # No grid: the whole (tiny) problem is one invocation; every operand
        # is a whole-array VMEM block.  At real SD sizes this is where the
        # Nl-tiled grid + single-buffered weight BlockSpecs go (see TODOs).
        return pl.pallas_call(
            _fused_sd_kernel,
            out_shape=out_shape,
            compiler_params=pltpu.CompilerParams(
                vmem_limit_bytes=32 * 1024 * 1024),
        )(patches, eps, noise, sa, sb, temb_rep, tembq_rep, ctx,
          self.w_mean, self.w_logvar, self.w_in, self.w_inq,
          self.w_k, self.w_v, self.w_o, self.w_out)

    # ---------------------------------------------------------------
    def forward(self, pixel_values, hidden_states, key):
        B, Cin, H, W = pixel_values.shape
        s = VAE_SCALE
        Hl, Wl = H // s, W // s
        Nl = Hl * Wl
        BN = B * Nl
        P = Cin * s * s
        C = LATENT_CH

        k_sample, k_noise, k_t = jax.random.split(key, 3)

        # Single NCHW -> token-major [B*Nl, P] layout conversion (bf16 for MXU).
        p = pixel_values.astype(jnp.float32).reshape(B, Cin, Hl, s, Wl, s)
        patches = jnp.transpose(p, (0, 2, 4, 1, 3, 5)).reshape(
            BN, P).astype(jnp.bfloat16)

        # Latent-space randomness (i.i.d. Gaussian; layout-agnostic).
        eps = jax.random.normal(k_sample, (BN, C), jnp.float32)
        noise = jax.random.normal(k_noise, (BN, C), jnp.float32)
        timesteps = jax.random.randint(k_t, (B,), 0, NUM_TRAIN_TIMESTEPS,
                                       jnp.int32)

        # Per-batch DDPM scalars expanded to per-row columns (batch folded).
        ac = self.alphas_cumprod[timesteps]                       # [B]
        sa = jnp.repeat(jnp.sqrt(ac), Nl)[:, None]                # [BN, 1]
        sb = jnp.repeat(jnp.sqrt(1.0 - ac), Nl)[:, None]          # [BN, 1]

        # Timestep conditioning (+ precomposed Q-path version).
        temb = self._timestep_embedding(timesteps)                # [B, D]
        tembq = temb @ self._w_q_f32                              # [B, D]
        temb_rep = jnp.repeat(temb, Nl, axis=0)                   # [BN, D]
        tembq_rep = jnp.repeat(tembq, Nl, axis=0)                 # [BN, D]

        ctx = hidden_states.astype(jnp.bfloat16)                  # [B, S, Dt]

        noise_pred_bcn, v_target_bcn = self._fused_call(
            patches, eps, noise, sa, sb, temb_rep, tembq_rep, ctx, B, Nl)

        if PREDICTION_TYPE == "epsilon":
            target_bcn = jnp.transpose(noise.reshape(B, Nl, C), (0, 2, 1))
        elif PREDICTION_TYPE == "v_prediction":
            target_bcn = v_target_bcn
        else:
            raise ValueError(f"Unknown prediction type {PREDICTION_TYPE}")

        # Channel-major (B, C, Nl) -> NCHW is a free reshape.
        def to_nchw(t):
            return t.reshape(B, C, Hl, Wl)

        return to_nchw(noise_pred_bcn), to_nchw(target_bcn)


# ------------------------------------------------------------------
if __name__ == "__main__":
    key = jax.random.PRNGKey(0)
    k_pix, k_ctx, k_fwd, k_params = jax.random.split(key, 4)

    B, Cin, H, W = 2, 3, 32, 32      # NCHW pixel values
    S, TD = 8, 32                    # text seq len, text hidden dim

    pixel_values = jax.random.normal(k_pix, (B, Cin, H, W), jnp.float32)
    hidden_states = jax.random.normal(k_ctx, (B, S, TD), jnp.float32)

    pipe = Text2ImageSDPipelinePallas(in_ch=Cin, text_dim=TD, key=k_params)
    noise_pred, target = pipe.forward(pixel_values, hidden_states, k_fwd)

    jax.block_until_ready(noise_pred)
    jax.block_until_ready(target)

    assert noise_pred.shape == (B, 4, H // 8, W // 8), noise_pred.shape
    assert target.shape == (B, 4, H // 8, W // 8), target.shape
    assert bool(jnp.all(jnp.isfinite(noise_pred)))
    assert bool(jnp.all(jnp.isfinite(target)))

    print("KERNEL_OK")
</pallas_src>

<mosaic_0001>
module attributes {stable_mosaic.version = 11 : i64} {
  func.func @_fused_sd_kernel(%arg0: memref<32x192xbf16, #tpu.memory_space<vmem>>, %arg1: memref<32x4xf32, #tpu.memory_space<vmem>>, %arg2: memref<32x4xf32, #tpu.memory_space<vmem>>, %arg3: memref<32x1xf32, #tpu.memory_space<vmem>>, %arg4: memref<32x1xf32, #tpu.memory_space<vmem>>, %arg5: memref<32x128xf32, #tpu.memory_space<vmem>>, %arg6: memref<32x128xf32, #tpu.memory_space<vmem>>, %arg7: memref<2x8x32xbf16, #tpu.memory_space<vmem>>, %arg8: memref<192x4xbf16, #tpu.memory_space<vmem>>, %arg9: memref<192x4xbf16, #tpu.memory_space<vmem>>, %arg10: memref<4x128xbf16, #tpu.memory_space<vmem>>, %arg11: memref<4x128xbf16, #tpu.memory_space<vmem>>, %arg12: memref<32x128xbf16, #tpu.memory_space<vmem>>, %arg13: memref<32x128xbf16, #tpu.memory_space<vmem>>, %arg14: memref<128x128xbf16, #tpu.memory_space<vmem>>, %arg15: memref<128x4xbf16, #tpu.memory_space<vmem>>, %arg16: memref<2x4x16xf32, #tpu.memory_space<vmem>>, %arg17: memref<2x4x16xf32, #tpu.memory_space<vmem>>) attributes {dimension_semantics = [], scalar_prefetch = 0 : i64, scratch_operands = 0 : i64, tpu.core_type = #tpu.core_type<tc>} {
    %c0 = arith.constant 0 : index
    %c0_0 = arith.constant 0 : index
    %0 = vector.load %arg0[%c0, %c0_0] : memref<32x192xbf16, #tpu.memory_space<vmem>>, vector<32x192xbf16>
    %c0_1 = arith.constant 0 : index
    %c0_2 = arith.constant 0 : index
    %1 = vector.load %arg8[%c0_1, %c0_2] : memref<192x4xbf16, #tpu.memory_space<vmem>>, vector<192x4xbf16>
    %cst = arith.constant dense<0.000000e+00> : vector<32x4xf32>
    %2 = tpu.matmul %0, %1, %cst {dimension_numbers = #tpu.dot_dimension_numbers<[1], [0], [0], [1], [0, 0, 1, 1], [], []>} : vector<32x192xbf16>, vector<192x4xbf16>, vector<32x4xf32> -> vector<32x4xf32>
    %c0_3 = arith.constant 0 : index
    %c0_4 = arith.constant 0 : index
    %3 = vector.load %arg9[%c0_3, %c0_4] : memref<192x4xbf16, #tpu.memory_space<vmem>>, vector<192x4xbf16>
    %cst_5 = arith.constant dense<0.000000e+00> : vector<32x4xf32>
    %4 = tpu.matmul %0, %3, %cst_5 {dimension_numbers = #tpu.dot_dimension_numbers<[1], [0], [0], [1], [0, 0, 1, 1], [], []>} : vector<32x192xbf16>, vector<192x4xbf16>, vector<32x4xf32> -> vector<32x4xf32>
    %cst_6 = arith.constant -3.000000e+01 : f32
    %cst_7 = arith.constant 2.000000e+01 : f32
    %5 = vector.broadcast %cst_6 : f32 to vector<32x4xf32>
    %6 = arith.maximumf %5, %4 : vector<32x4xf32>
    %7 = vector.broadcast %cst_7 : f32 to vector<32x4xf32>
    %8 = arith.minimumf %7, %6 : vector<32x4xf32>
    %cst_8 = arith.constant 5.000000e-01 : f32
    %9 = vector.broadcast %cst_8 : f32 to vector<32x4xf32>
    %10 = arith.mulf %9, %8 : vector<32x4xf32>
    %11 = math.exp %10 : vector<32x4xf32>
    %c0_9 = arith.constant 0 : index
    %c0_10 = arith.constant 0 : index
    %12 = vector.load %arg1[%c0_9, %c0_10] : memref<32x4xf32, #tpu.memory_space<vmem>>, vector<32x4xf32>
    %13 = arith.mulf %11, %12 : vector<32x4xf32>
    %14 = arith.addf %2, %13 : vector<32x4xf32>
    %cst_11 = arith.constant 1.821500e-01 : f32
    %15 = vector.broadcast %cst_11 : f32 to vector<32x4xf32>
    %16 = arith.mulf %14, %15 : vector<32x4xf32>
    %c0_12 = arith.constant 0 : index
    %c0_13 = arith.constant 0 : index
    %17 = vector.load %arg2[%c0_12, %c0_13] : memref<32x4xf32, #tpu.memory_space<vmem>>, vector<32x4xf32>
    %c0_14 = arith.constant 0 : index
    %c0_15 = arith.constant 0 : index
    %18 = vector.load %arg3[%c0_14, %c0_15] : memref<32x1xf32, #tpu.memory_space<vmem>>, vector<32x1xf32>
    %c0_16 = arith.constant 0 : index
    %c0_17 = arith.constant 0 : index
    %19 = vector.load %arg4[%c0_16, %c0_17] : memref<32x1xf32, #tpu.memory_space<vmem>>, vector<32x1xf32>
    %20 = vector.broadcast %18 : vector<32x1xf32> to vector<32x4xf32>
    %21 = arith.mulf %20, %16 : vector<32x4xf32>
    %22 = vector.broadcast %19 : vector<32x1xf32> to vector<32x4xf32>
    %23 = arith.mulf %22, %17 : vector<32x4xf32>
    %24 = arith.addf %21, %23 : vector<32x4xf32>
    %25 = vector.broadcast %18 : vector<32x1xf32> to vector<32x4xf32>
    %26 = arith.mulf %25, %17 : vector<32x4xf32>
    %27 = vector.broadcast %19 : vector<32x1xf32> to vector<32x4xf32>
    %28 = arith.mulf %27, %16 : vector<32x4xf32>
    %29 = arith.subf %26, %28 : vector<32x4xf32>
    %30 = arith.truncf %24 : vector<32x4xf32> to vector<32x4xbf16>
    %c0_18 = arith.constant 0 : index
    %c0_19 = arith.constant 0 : index
    %31 = vector.load %arg10[%c0_18, %c0_19] : memref<4x128xbf16, #tpu.memory_space<vmem>>, vector<4x128xbf16>
    %cst_20 = arith.constant dense<0.000000e+00> : vector<32x128xf32>
    %32 = tpu.matmul %30, %31, %cst_20 {dimension_numbers = #tpu.dot_dimension_numbers<[1], [0], [0], [1], [0, 0, 1, 1], [], []>} : vector<32x4xbf16>, vector<4x128xbf16>, vector<32x128xf32> -> vector<32x128xf32>
    %c0_21 = arith.constant 0 : index
    %c0_22 = arith.constant 0 : index
    %33 = vector.load %arg5[%c0_21, %c0_22] : memref<32x128xf32, #tpu.memory_space<vmem>>, vector<32x128xf32>
    %34 = arith.addf %32, %33 : vector<32x128xf32>
    %c0_23 = arith.constant 0 : index
    %c0_24 = arith.constant 0 : index
    %35 = vector.load %arg11[%c0_23, %c0_24] : memref<4x128xbf16, #tpu.memory_space<vmem>>, vector<4x128xbf16>
    %cst_25 = arith.constant dense<0.000000e+00> : vector<32x128xf32>
    %36 = tpu.matmul %30, %35, %cst_25 {dimension_numbers = #tpu.dot_dimension_numbers<[1], [0], [0], [1], [0, 0, 1, 1], [], []>} : vector<32x4xbf16>, vector<4x128xbf16>, vector<32x128xf32> -> vector<32x128xf32>
    %c0_26 = arith.constant 0 : index
    %c0_27 = arith.constant 0 : index
    %37 = vector.load %arg6[%c0_26, %c0_27] : memref<32x128xf32, #tpu.memory_space<vmem>>, vector<32x128xf32>
    %38 = arith.addf %36, %37 : vector<32x128xf32>
    %c0_28 = arith.constant 0 : index
    %c0_29 = arith.constant 0 : index
    %c0_30 = arith.constant 0 : index
    %39 = vector.load %arg7[%c0_28, %c0_29, %c0_30] : memref<2x8x32xbf16, #tpu.memory_space<vmem>>, vector<2x8x32xbf16>
    %c0_31 = arith.constant 0 : index
    %c0_32 = arith.constant 0 : index
    %40 = vector.load %arg12[%c0_31, %c0_32] : memref<32x128xbf16, #tpu.memory_space<vmem>>, vector<32x128xbf16>
    "tpu.trace_start"() <{level = 10 : i32, message = "bst,td->bsd"}> : () -> ()
    %cst_33 = arith.constant dense<0.000000e+00> : vector<2x8x128xf32>
    %41 = tpu.matmul %39, %40, %cst_33 {dimension_numbers = #tpu.dot_dimension_numbers<[2], [0], [0, 1], [1], [0, 0, 0, 1, 1, 1], [], []>} : vector<2x8x32xbf16>, vector<32x128xbf16>, vector<2x8x128xf32> -> vector<2x8x128xf32>
    "tpu.trace_stop"() : () -> ()
    %42 = arith.truncf %41 : vector<2x8x128xf32> to vector<2x8x128xbf16>
    %c0_34 = arith.constant 0 : index
    %c0_35 = arith.constant 0 : index
    %43 = vector.load %arg13[%c0_34, %c0_35] : memref<32x128xbf16, #tpu.memory_space<vmem>>, vector<32x128xbf16>
    "tpu.trace_start"() <{level = 10 : i32, message = "bst,td->bsd"}> : () -> ()
    %cst_36 = arith.constant dense<0.000000e+00> : vector<2x8x128xf32>
    %44 = tpu.matmul %39, %43, %cst_36 {dimension_numbers = #tpu.dot_dimension_numbers<[2], [0], [0, 1], [1], [0, 0, 0, 1, 1, 1], [], []>} : vector<2x8x32xbf16>, vector<32x128xbf16>, vector<2x8x128xf32> -> vector<2x8x128xf32>
    "tpu.trace_stop"() : () -> ()
    %45 = arith.truncf %44 : vector<2x8x128xf32> to vector<2x8x128xbf16>
    %46 = arith.truncf %38 : vector<32x128xf32> to vector<32x128xbf16>
    %47 = vector.shape_cast %46 : vector<32x128xbf16> to vector<2x16x128xbf16>
    "tpu.trace_start"() <{level = 10 : i32, message = "bnd,bsd->bns"}> : () -> ()
    %cst_37 = arith.constant dense<0.000000e+00> : vector<2x16x8xf32>
    %48 = tpu.matmul %47, %42, %cst_37 {dimension_numbers = #tpu.dot_dimension_numbers<[2], [2], [1], [1], [0, 0, 0, 1, 1, 1], [0], [0]>} : vector<2x16x128xbf16>, vector<2x8x128xbf16>, vector<2x16x8xf32> -> vector<2x16x8xf32>
    "tpu.trace_stop"() : () -> ()
    %cst_38 = arith.constant 0.0883883461 : f32
    %49 = vector.broadcast %cst_38 : f32 to vector<2x16x8xf32>
    %50 = arith.mulf %48, %49 : vector<2x16x8xf32>
    %cst_39 = arith.constant dense<0xFF800000> : vector<2x16xf32>
    %51 = vector.multi_reduction <maximumf>, %50, %cst_39 [2] : vector<2x16x8xf32> to vector<2x16xf32>
    %52 = vector.shape_cast %51 : vector<2x16xf32> to vector<2x16x1xf32>
    %53 = vector.broadcast %52 : vector<2x16x1xf32> to vector<2x16x8xf32>
    %54 = arith.subf %50, %53 : vector<2x16x8xf32>
    %55 = math.exp %54 : vector<2x16x8xf32>
    %cst_40 = arith.constant dense<0.000000e+00> : vector<2x16xf32>
    %56 = vector.multi_reduction <add>, %55, %cst_40 [2] : vector<2x16x8xf32> to vector<2x16xf32>
    %57 = vector.shape_cast %56 : vector<2x16xf32> to vector<2x16x1xf32>
    %58 = tpu.reciprocal %57 {approx = true} : vector<2x16x1xf32> -> vector<2x16x1xf32>
    %59 = vector.broadcast %58 : vector<2x16x1xf32> to vector<2x16x8xf32>
    %60 = arith.mulf %55, %59 : vector<2x16x8xf32>
    %61 = arith.truncf %60 : vector<2x16x8xf32> to vector<2x16x8xbf16>
    "tpu.trace_start"() <{level = 10 : i32, message = "bns,bsd->bnd"}> : () -> ()
    %cst_41 = arith.constant dense<0.000000e+00> : vector<2x16x128xf32>
    %62 = tpu.matmul %61, %45, %cst_41 {dimension_numbers = #tpu.dot_dimension_numbers<[2], [1], [1], [2], [0, 0, 0, 1, 1, 2], [0], [0]>} : vector<2x16x8xbf16>, vector<2x8x128xbf16>, vector<2x16x128xf32> -> vector<2x16x128xf32>
    "tpu.trace_stop"() : () -> ()
    %63 = vector.shape_cast %62 : vector<2x16x128xf32> to vector<32x128xf32>
    %64 = arith.truncf %63 : vector<32x128xf32> to vector<32x128xbf16>
    %c0_42 = arith.constant 0 : index
    %c0_43 = arith.constant 0 : index
    %65 = vector.load %arg14[%c0_42, %c0_43] : memref<128x128xbf16, #tpu.memory_space<vmem>>, vector<128x128xbf16>
    %cst_44 = arith.constant dense<0.000000e+00> : vector<32x128xf32>
    %66 = tpu.matmul %64, %65, %cst_44 {dimension_numbers = #tpu.dot_dimension_numbers<[1], [0], [0], [1], [0, 0, 1, 1], [], []>} : vector<32x128xbf16>, vector<128x128xbf16>, vector<32x128xf32> -> vector<32x128xf32>
    %67 = arith.addf %34, %66 : vector<32x128xf32>
    %68 = arith.truncf %67 : vector<32x128xf32> to vector<32x128xbf16>
    %c0_45 = arith.constant 0 : index
    %c0_46 = arith.constant 0 : index
    %69 = vector.load %arg15[%c0_45, %c0_46] : memref<128x4xbf16, #tpu.memory_space<vmem>>, vector<128x4xbf16>
    %cst_47 = arith.constant dense<0.000000e+00> : vector<32x4xf32>
    %70 = tpu.matmul %68, %69, %cst_47 {dimension_numbers = #tpu.dot_dimension_numbers<[1], [0], [0], [1], [0, 0, 1, 1], [], []>} : vector<32x128xbf16>, vector<128x4xbf16>, vector<32x4xf32> -> vector<32x4xf32>
    %71 = vector.extract_strided_slice %70 {offsets = [0, 0], sizes = [16, 4], strides = [1, 1]} : vector<32x4xf32> to vector<16x4xf32>
    %72 = tpu.transpose %71, [1, 0] : vector<16x4xf32> -> vector<4x16xf32>
    %c0_48 = arith.constant 0 : index
    %c0_49 = arith.constant 0 : index
    %c0_50 = arith.constant 0 : index
    %73 = vector.load %arg16[%c0_48, %c0_49, %c0_50] : memref<2x4x16xf32, #tpu.memory_space<vmem>>, vector<1x4x16xf32>
    %74 = vector.shape_cast %73 : vector<1x4x16xf32> to vector<4x16xf32>
    %75 = vector.shape_cast %72 : vector<4x16xf32> to vector<1x4x16xf32>
    tpu.vector_store %arg16[%c0_48, %c0_49, %c0_50], %75 {strides = array<i32>} : memref<2x4x16xf32, #tpu.memory_space<vmem>>, vector<1x4x16xf32>,
    %76 = vector.extract_strided_slice %29 {offsets = [0, 0], sizes = [16, 4], strides = [1, 1]} : vector<32x4xf32> to vector<16x4xf32>
    %77 = tpu.transpose %76, [1, 0] : vector<16x4xf32> -> vector<4x16xf32>
    %c0_51 = arith.constant 0 : index
    %c0_52 = arith.constant 0 : index
    %c0_53 = arith.constant 0 : index
    %78 = vector.load %arg17[%c0_51, %c0_52, %c0_53] : memref<2x4x16xf32, #tpu.memory_space<vmem>>, vector<1x4x16xf32>
    %79 = vector.shape_cast %78 : vector<1x4x16xf32> to vector<4x16xf32>
    %80 = vector.shape_cast %77 : vector<4x16xf32> to vector<1x4x16xf32>
    tpu.vector_store %arg17[%c0_51, %c0_52, %c0_53], %80 {strides = array<i32>} : memref<2x4x16xf32, #tpu.memory_space<vmem>>, vector<1x4x16xf32>,
    %81 = vector.extract_strided_slice %70 {offsets = [16, 0], sizes = [16, 4], strides = [1, 1]} : vector<32x4xf32> to vector<16x4xf32>
    %82 = tpu.transpose %81, [1, 0] : vector<16x4xf32> -> vector<4x16xf32>
    %c1 = arith.constant 1 : index
    %c0_54 = arith.constant 0 : index
    %c0_55 = arith.constant 0 : index
    %83 = vector.load %arg16[%c1, %c0_54, %c0_55] : memref<2x4x16xf32, #tpu.memory_space<vmem>>, vector<1x4x16xf32>
    %84 = vector.shape_cast %83 : vector<1x4x16xf32> to vector<4x16xf32>
    %85 = vector.shape_cast %82 : vector<4x16xf32> to vector<1x4x16xf32>
    tpu.vector_store %arg16[%c1, %c0_54, %c0_55], %85 {strides = array<i32>} : memref<2x4x16xf32, #tpu.memory_space<vmem>>, vector<1x4x16xf32>,
    %86 = vector.extract_strided_slice %29 {offsets = [16, 0], sizes = [16, 4], strides = [1, 1]} : vector<32x4xf32> to vector<16x4xf32>
    %87 = tpu.transpose %86, [1, 0] : vector<16x4xf32> -> vector<4x16xf32>
    %c1_56 = arith.constant 1 : index
    %c0_57 = arith.constant 0 : index
    %c0_58 = arith.constant 0 : index
    %88 = vector.load %arg17[%c1_56, %c0_57, %c0_58] : memref<2x4x16xf32, #tpu.memory_space<vmem>>, vector<1x4x16xf32>
    %89 = vector.shape_cast %88 : vector<1x4x16xf32> to vector<4x16xf32>
    %90 = vector.shape_cast %87 : vector<4x16xf32> to vector<1x4x16xf32>
    tpu.vector_store %arg17[%c1_56, %c0_57, %c0_58], %90 {strides = array<i32>} : memref<2x4x16xf32, #tpu.memory_space<vmem>>, vector<1x4x16xf32>,
    return
  }
}

</mosaic_0001>

<bundles_post_ra>
// kernel: tpu_custom_call.1
= control target key start
LH: loop header
LB: loop body
LE: loop exit
PB: predicated region body
PF: predicated region fallthrough
CT: control target
= control target key end

     0   :  { %s2154_s0 = inlined_call_operand.vmem [shape: bf16[32,192], index: 0, kind: input, shape index: {}]   ;;  %s2155_s1 = inlined_call_operand.vmem [shape: f32[32,4], index: 1, kind: input, shape index: {}]   ;;  %s2156_s2 = inlined_call_operand.vmem [shape: f32[32,4], index: 2, kind: input, shape index: {}]   ;;  %s2157_s3 = inlined_call_operand.vmem [shape: f32[32,1], index: 3, kind: input, shape index: {}]   ;;  %s2158_s4 = inlined_call_operand.vmem [shape: f32[32,1], index: 4, kind: input, shape index: {}]   ;;  %s2159_s5 = inlined_call_operand.vmem [shape: f32[32,128], index: 5, kind: input, shape index: {}]   ;;  %s2160_s6 = inlined_call_operand.vmem [shape: f32[32,128], index: 6, kind: input, shape index: {}]   ;;  %s2161_s7 = inlined_call_operand.vmem [shape: bf16[2,8,32], index: 7, kind: input, shape index: {}]   ;;  %s2162_s8 = inlined_call_operand.vmem [shape: bf16[192,4], index: 8, kind: input, shape index: {}]   ;;  %s2163_s9 = inlined_call_operand.vmem [shape: bf16[192,4], index: 9, kind: input, shape index: {}]   ;;  %s2164_s10 = inlined_call_operand.vmem [shape: bf16[4,128], index: 10, kind: input, shape index: {}]   ;;  %s2165_s11 = inlined_call_operand.vmem [shape: bf16[4,128], index: 11, kind: input, shape index: {}]   ;;  %s2166_s12 = inlined_call_operand.vmem [shape: bf16[32,128], index: 12, kind: input, shape index: {}]   ;;  %s2167_s13 = inlined_call_operand.vmem [shape: bf16[32,128], index: 13, kind: input, shape index: {}]   ;;  %s2168_s14 = inlined_call_operand.vmem [shape: bf16[128,128], index: 14, kind: input, shape index: {}]   ;;  %s2169_s15 = inlined_call_operand.vmem [shape: bf16[128,4], index: 15, kind: input, shape index: {}]   ;;  %s2170_s16 = inlined_call_operand.hbm [shape: f32[2,4,16], index: 16, kind: output, shape index: {0}]   ;;  %s2171_s17 = inlined_call_operand.hbm [shape: f32[2,4,16], index: 17, kind: output, shape index: {1}]  }
   0x1   :  { %2174 = sst [smem:[#allocation8_spill]] %s2154_s0 }
   0x2   :  { %2175 = sst [smem:[#allocation9_spill]] %s2155_s1 }
   0x3   :  { %23 = vsyncpa [#allocation3], 0  ;;  %v1581_v0 = vld [vmem:[%s2163_s9] sm:$0xff]   ;;  %v1704_v1 = vmov 0   ;;  %v1582_v2 = vld [vmem:[%s2163_s9 + $0x8] sm:$0xff]   ;;  %vm200_vm0 = vcmask 523264  }
   0x4   :  { %207 = vmatprep.subr.bf16.mxu0 %v1704_v1  ;;  %356 = vmatprep.subr.bf16.mxu1 %v1704_v1  ;;  %v1586_v3 = vld [vmem:[%s2162_s8] sm:$0xff]   ;;  %v1583_v4 = vld [vmem:[%s2163_s9 + $0x10] sm:$0xff]   ;;  %v1588_v5 = vld [vmem:[%s2162_s8 + $0x8] sm:$0xff]   ;;  %s2176_s19 = sld [smem:[#allocation8_spill]] }
   0x5   :  { %208 = vmatpush1.bf16.msra.mxu0 %v1581_v0  ;;  %1580 = vset.pattern.permute.xlu1 %v1704_v1  ;;  %v1584_v6 = vld [vmem:[%s2163_s9 + $0x18] sm:$0xff]   ;;  %v1590_v7 = vld [vmem:[%s2162_s8 + $0x10] sm:$0xff]   ;;  %v1585_v8 = vld [vmem:[%s2163_s9 + $0x20] sm:$0xff]  }
   0x6   :  { %209 = vmatprep.subr.bf16.mxu0 %v1704_v1  ;;  %1579 = vset.pattern.permute.xlu0 %v1704_v1  ;;  %v1592_v9 = vld [vmem:[%s2162_s8 + $0x18] sm:$0xff]   ;;  %v1587_v10 = vld [vmem:[%s2163_s9 + $0x28] sm:$0xff]   ;;  %v1594_v11 = vld [vmem:[%s2162_s8 + $0x20] sm:$0xff]  }
   0x7   :  { %357 = vmatpush1.bf16.msra.mxu1 %v1586_v3  ;;  %v1589_v13 = vld [vmem:[%s2163_s9 + $0x30] sm:$0xff]   ;;  %v1596_v14 = vld [vmem:[%s2162_s8 + $0x28] sm:$0xff]   ;;  %v1591_v15 = vld [vmem:[%s2163_s9 + $0x38] sm:$0xff]  }
   0x8   :  { %358 = vmatprep.subr.bf16.mxu1 %v1704_v1  ;;  %v417_v16 = vld [vmem:[%s2158_s4] sm:$0xff]  ;;  %v1598_v17 = vld [vmem:[%s2162_s8 + $0x30] sm:$0xff]   ;;  %v418_v20 = vld [vmem:[%s2158_s4 + $0x8] sm:$0xff] }
   0x9   :  { %210 = vmatpush1.bf16.msra.mxu0 %v1582_v2  ;;  %v413_v18 = vld [vmem:[%s2157_s3] sm:$0xff]  ;;  %447 = vperm.xlu1 %1580, %v417_v16   ;;  %v1603_v21 = vld [vmem:[%s2162_s8 + $0x38] sm:$0xff]   ;;  %v414_v22 = vld [vmem:[%s2157_s3 + $0x8] sm:$0xff] }
   0xa   :  { %211 = vmatprep.subr.bf16.mxu0 %v1704_v1  ;;  %v1602_v12 = vld [vmem:[%s2176_s19 + $0x4] ss:$8 sps:$4 sm:$0xff]   ;;  %423 = vperm.xlu0 %1579, %v413_v18   ;;  %v416_v23 = vld [vmem:[%s2157_s3 + $0x18] sm:$0xff]  ;;  %v415_v25 = vld [vmem:[%s2157_s3 + $0x10] sm:$0xff] }
   0xb   :  { %359 = vmatpush1.bf16.msra.mxu1 %v1588_v5  ;;  %1385 = vmatprep.mubr.msk.bf16.mxu0 %vm200_vm0, %v1602_v12  ;;  %v1593_v19 = vld [vmem:[%s2163_s9 + $0x40] sm:$0xff]   ;;  %v1595_v24 = vld [vmem:[%s2163_s9 + $0x48] sm:$0xff]   ;;  %v420_v27 = vld [vmem:[%s2158_s4 + $0x18] sm:$0xff] }
   0xc   :  { %360 = vmatprep.subr.bf16.mxu1 %v1704_v1  ;;  %1399 = vmatprep.mubr.msk.bf16.mxu1 %vm200_vm0, %v1602_v12  ;;  %v1604_v26 = vld [vmem:[%s2162_s8 + $0x40] sm:$0xff]   ;;  %v1597_v28 = vld [vmem:[%s2163_s9 + $0x50] sm:$0xff]   ;;  %v1607_v30 = vld [vmem:[%s2162_s8 + $0x48] sm:$0xff]  }
   0xd   :  { %212 = vmatpush1.bf16.msra.mxu0 %v1583_v4  ;;  %452 = vperm.xlu1 %1580, %v418_v20   ;;  %v419_v29 = vld [vmem:[%s2158_s4 + $0x10] sm:$0xff]  ;;  %v1599_v31 = vld [vmem:[%s2163_s9 + $0x58] sm:$0xff]  }
   0xe   :  { %213 = vmatprep.subr.bf16.mxu0 %v1704_v1  ;;  %428 = vperm.xlu0 %1579, %v414_v22   ;;  %v1609_v32 = vld [vmem:[%s2162_s8 + $0x50] sm:$0xff]  }
   0xf   :  { %361 = vmatpush1.bf16.msra.mxu1 %v1590_v7 }
  0x10   :  { %362 = vmatprep.subr.bf16.mxu1 %v1704_v1 }
  0x11   :  { %214 = vmatpush1.bf16.msra.mxu0 %v1584_v6  ;;  %438 = vperm.xlu1 %1580, %v416_v23  }
  0x12   :  { %215 = vmatprep.subr.bf16.mxu0 %v1704_v1  ;;  %433 = vperm.xlu0 %1579, %v415_v25  }
  0x13   :  { %363 = vmatpush1.bf16.msra.mxu1 %v1592_v9 }
  0x14   :  { %364 = vmatprep.subr.bf16.mxu1 %v1704_v1 }
  0x15   :  { %216 = vmatpush1.bf16.msra.mxu0 %v1585_v8  ;;  %462 = vperm.xlu1 %1580, %v420_v27  }
  0x16   :  { %217 = vmatprep.subr.bf16.mxu0 %v1704_v1  ;;  %457 = vperm.xlu0 %1579, %v419_v29  }
  0x17   :  { %365 = vmatpush1.bf16.msra.mxu1 %v1594_v11 }
  0x18   :  { %366 = vmatprep.subr.bf16.mxu1 %v1704_v1 }
  0x19   :  { %218 = vmatpush1.bf16.msra.mxu0 %v1587_v10 }
  0x1a   :  { %219 = vmatprep.subr.bf16.mxu0 %v1704_v1 }
  0x1b   :  { %367 = vmatpush1.bf16.msra.mxu1 %v1596_v14 }
  0x1c   :  { %368 = vmatprep.subr.bf16.mxu1 %v1704_v1 }
  0x1d   :  { %220 = vmatpush1.bf16.msra.mxu0 %v1589_v13 }
  0x1e   :  { %221 = vmatprep.subr.bf16.mxu0 %v1704_v1 }
  0x1f   :  { %369 = vmatpush1.bf16.msra.mxu1 %v1598_v17 }
  0x20   :  { %370 = vmatprep.subr.bf16.mxu1 %v1704_v1 }
  0x21   :  { %222 = vmatpush1.bf16.msra.mxu0 %v1591_v15 }
  0x22   :  { %223 = vmatprep.subr.bf16.mxu0 %v1704_v1 }
  0x23   :  { %371 = vmatpush1.bf16.msra.mxu1 %v1603_v21 }
  0x24   :  { %372 = vmatprep.subr.bf16.mxu1 %v1704_v1 }
  0x25   :  { %224 = vmatpush1.bf16.msra.mxu0 %v1593_v19 }
  0x26   :  { %225 = vmatprep.subr.bf16.mxu0 %v1704_v1 }
  0x27   :  { %373 = vmatpush1.bf16.msra.mxu1 %v1604_v26 }
  0x28   :  { %374 = vmatprep.subr.bf16.mxu1 %v1704_v1 }
  0x29   :  { %226 = vmatpush1.bf16.msra.mxu0 %v1595_v24 }
  0x2a   :  { %227 = vmatprep.subr.bf16.mxu0 %v1704_v1 }
  0x2b   :  { %375 = vmatpush1.bf16.msra.mxu1 %v1607_v30 }
  0x2d   :  { %228 = vmatpush1.bf16.msra.mxu0 %v1597_v28 }
  0x2e   :  { %229 = vmatprep.subr.bf16.mxu0 %v1704_v1 }
  0x2f   :  { %24 = vsyncpa [#allocation5], 0  ;;  %376 = vmatprep.subr.bf16.mxu1 %v1704_v1  ;;  %v1600_v33 = vld [vmem:[%s2176_s19] ss:$8 sps:$4 sm:$0xff]   ;;  %v1605_v34 = vld [vmem:[%s2176_s19 + $0x14] ss:$8 sps:$4 sm:$0xff]  }
  0x30   :  { %377 = vmatpush1.bf16.msra.mxu1 %v1609_v32  ;;  %v1610_v35 = vld [vmem:[%s2162_s8 + $0x58] sm:$0xff]   ;;  %v487_v37 = vld [vmem:[%s2164_s10] sm:$0x3]  ;;  %vm499_vm1 = vcmask 1041408   ;;  %v1705_v41 = vmov 0.0   ;;  %v410_v22 = vld [vmem:[%s2156_s2 + $0x8] sm:$0xff] }
  0x31   :  { %230 = vmatpush1.bf16.msra.mxu0 %v1599_v31  ;;  %378 = vmatprep.subr.bf16.mxu1 %v1704_v1  ;;  %v1608_v36 = vld [vmem:[%s2176_s19 + $0x10] ss:$8 sps:$4 sm:$0xff]   ;;  %v501_v38 = vsel %vm499_vm1, %v487_v37, 0  ;;  %v552_v39 = vld [vmem:[%s2165_s11] sm:$0x3]  ;;  %s2177_s19 = sld [smem:[#allocation9_spill]] }
  0x32   :  { %1570 = vmatprep.subr.msk.bf16.mxu0 %vm499_vm1, %v487_v37  ;;  %v558_v40 = vsel %vm499_vm1, %v552_v39, 0  ;;  %v409_v21 = vld [vmem:[%s2156_s2] sm:$0xff]  ;;  %vm492_vm2 = vcmask 31744   ;;  %vm1706_vm3 = vmmov 0   ;;  %vm632_vm4 = vcmask 261120  }
  0x33   :  { %vm876_vm5 = vcmask 1043456   ;;  %vm826_vm6 = vcmask 64512   ;;  %vm1234_vm7 = vcmask 125952  }
  0x34   :  { %240 = vmatmul.mubr.bf16.vlgmr.msra.gmra.mrb[0].mxu0 %v1600_v33  ;;  %379 = vmatpush1.bf16.msra.mxu1 %v1610_v35 }
  0x35   :  { %1386 = vmatprep.mubr.msk.bf16.mxu0 %vm200_vm0, %v1605_v34  ;;  %1471 = vmatpush3.bf16.msra.mxu0 %v501_v38 }
  0x36   :  { %1571 = vmatprep.subr.msk.bf16.mxu1 %vm499_vm1, %v552_v39  ;;  %1482 = vmatprep.subr.bf16.mxu0 %v1705_v41 }
  0x37   :  { %389 = vmatmul.mubr.bf16.vlgmr.msra.gmra.mrb[0].mxu1 %v1600_v33  ;;  %v276_v12 = vld [vmem:[%s2177_s19] sm:$0xff]  ;;  %v277_v14 = vld [vmem:[%s2177_s19 + $0x8] sm:$0xff]  ;;  %v278_v25 = vld [vmem:[%s2177_s19 + $0x10] sm:$0xff] }
  0x38   :  { %1400 = vmatprep.mubr.msk.bf16.mxu1 %vm200_vm0, %v1605_v34  ;;  %1477 = vmatpush3.bf16.msra.mxu1 %v558_v40  ;;  %v279_v35 = vld [vmem:[%s2177_s19 + $0x18] sm:$0xff] }
  0x39   :  { %1490 = vmatprep.subr.bf16.mxu1 %v1705_v41 }
  0x3c   :  { %248 = vmatmul.mubr.bf16.gmra.mrb[4].mxu0 %v1608_v36 }
  0x3f   :  { %397 = vmatmul.mubr.bf16.gmra.mrb[4].mxu1 %v1608_v36 }
  0x88   :  { %v448_v4 = vpop.permute.xlu1 %447 }
  0x89   :  { %v424_v8 = vpop.permute.xlu0 %423  ;;  %v465_v31 = vmul.f32 %v448_v4, %v409_v21 }
  0x8a   :  { %v1964_v32 = vmul.f32 %v424_v8, %v409_v21 }
  0x8c   :  { %v453_v15 = vpop.permute.xlu1 %452 }
  0x8d   :  { %v429_v18 = vpop.permute.xlu0 %428  ;;  %v466_v33 = vmul.f32 %v453_v15, %v410_v22 }
  0x8e   :  { %v1969_v36 = vmul.f32 %v429_v18, %v410_v22 }
  0x90   :  { %v439_v28 = vpop.permute.xlu1 %438 }
  0x91   :  { %v434_v34 = vpop.permute.xlu0 %433 }
 0x107   :  { %v241_v42 = vpop.f32.mrb[0].mxu0 }
 0x108   :  { %v256_v43 = vmax.f32 %v241_v42, -30.0  ;;  %v243_v44 = vpop.f32.mrb[1].mxu0 }
 0x109   :  { %v244_v45 = vpop.f32.mrb[2].mxu0 }
 0x10a   :  { %v260_v46 = vmin.f32 %v256_v43, 20.0  ;;  %v257_v47 = vmax.f32 %v244_v45, -30.0  ;;  %v246_v48 = vpop.f32.mrb[3].mxu0  ;;  %v390_v51 = vpop.f32.mrb[0].mxu1 }
 0x10b   :  { %v392_v52 = vpop.f32.mrb[1].mxu1  ;;  %v411_v48 = vld [vmem:[%s2156_s2 + $0x10] sm:$0xff] }
 0x10c   :  { %v264_v49 = vmul.f32 0.5, %v260_v46  ;;  %v261_v50 = vmin.f32 %v257_v47, 20.0  ;;  %v393_v55 = vpop.f32.mrb[2].mxu1 }
 0x10d   :  { %v395_v57 = vpop.f32.mrb[3].mxu1 }
 0x10e   :  { %v268_v53 = vmul.f32 1.442695, %v264_v49  ;;  %v265_v54 = vmul.f32 0.5, %v261_v50  ;;  %v412_v49 = vld [vmem:[%s2156_s2 + $0x18] sm:$0xff] }
 0x10f   :  { %v249_v56 = vpop.f32.mrb[4].mxu0 }
 0x110   :  { %1632 = vpow2.f32 %v268_v53  ;;  %v270_v58 = vmul.f32 1.442695, %v265_v54  ;;  %v258_v59 = vmax.f32 %v249_v56, -30.0  ;;  %v251_v60 = vpop.f32.mrb[5].mxu0  ;;  %v458_v54 = vpop.permute.xlu0 %457 }
 0x111   :  { %v252_v61 = vpop.f32.mrb[6].mxu0 }
 0x112   :  { %1634 = vpow2.f32 %v270_v58  ;;  %v262_v62 = vmin.f32 %v258_v59, 20.0  ;;  %v259_v63 = vmax.f32 %v252_v61, -30.0  ;;  %v254_v0 = vpop.f32.mrb[7].mxu0  ;;  %v398_v3 = vpop.f32.mrb[4].mxu1  ;;  %v1989_v59 = vmul.f32 %v439_v28, %v412_v49 }
 0x113   :  { %v400_v5 = vpop.f32.mrb[5].mxu1  ;;  %v467_v61 = vmul.f32 %v458_v54, %v411_v48 }
 0x114   :  { %v266_v1 = vmul.f32 0.5, %v262_v62  ;;  %v263_v2 = vmin.f32 %v259_v63, 20.0  ;;  %v401_v9 = vpop.f32.mrb[6].mxu1 }
 0x115   :  { %v403_v10 = vpop.f32.mrb[7].mxu1 }
 0x116   :  { %v272_v6 = vmul.f32 1.442695, %v266_v1  ;;  %v267_v7 = vmul.f32 0.5, %v263_v2  ;;  %v555_v10 = vld [vmem:[%s2160_s6 + $0x10] sm:$0xff] }
 0x118   :  { %1636 = vpow2.f32 %v272_v6  ;;  %v274_v11 = vmul.f32 1.442695, %v267_v7  ;;  %v1612_v6 = vld [vmem:[%s2166_s12 + $0x8] sm:$0xff]   ;;  %v1613_v7 = vld [vmem:[%s2161_s7] sm:$0xff]  }
 0x11a   :  { %v1633_v13 = vpop.eup %1632  ;;  %1638 = vpow2.f32 %v274_v11 }
 0x11b   :  { %v280_v16 = vmul.f32 %v1633_v13, %v276_v12  ;;  %v556_v12 = vld [vmem:[%s2160_s6 + $0x18] sm:$0xff] }
 0x11c   :  { %v1635_v17 = vpop.eup %1634 }
 0x11d   :  { %v391_v19 = vadd.f32 %v390_v51, %v280_v16  ;;  %v281_v20 = vmul.f32 %v1635_v17, %v277_v14  ;;  %v463_v51 = vpop.permute.xlu1 %462  ;;  %v553_v14 = vld [vmem:[%s2160_s6] sm:$0xff] }
 0x11e   :  { %v468_v60 = vmul.f32 %v463_v51, %v412_v49 }
 0x11f   :  { %v405_v23 = vmul.f32 0.18215, %v391_v19  ;;  %v394_v24 = vadd.f32 %v393_v55, %v281_v20  ;;  %v1983_v55 = vmul.f32 %v434_v34, %v411_v48 }
 0x121   :  { %v441_v26 = vmul.f32 %v424_v8, %v405_v23  ;;  %v1962_v27 = vmul.f32 %v448_v4, %v405_v23  ;;  %v406_v29 = vmul.f32 0.18215, %v394_v24  ;;  %v1611_v4 = vld [vmem:[%s2166_s12] sm:$0xff]  }
 0x122   :  { %v1637_v30 = vpop.eup %1636  ;;  %v1614_v8 = vld [vmem:[%s2167_s13] sm:$0xff]  }
 0x123   :  { %v442_v37 = vmul.f32 %v429_v18, %v406_v29  ;;  %v1971_v38 = vmul.f32 %v453_v15, %v406_v29  ;;  %v282_v39 = vmul.f32 %v1637_v30, %v278_v25  ;;  %v469_v42 = vadd.f32 %v465_v31, %v441_v26  ;;  %v554_v15 = vld [vmem:[%s2160_s6 + $0x8] sm:$0xff] }
 0x124   :  { %v1639_v40 = vpop.eup %1638  ;;  %v481_v43 = vsub.f32 %v1964_v32, %v1962_v27  ;;  %v1617_v27 = vld [vmem:[%s2168_s14 + $0x8] sm:$0xff]  }
 0x125   :  { %v470_v44 = vadd.f32 %v466_v33, %v442_v37  ;;  %v482_v45 = vsub.f32 %v1969_v36, %v1971_v38  ;;  %v399_v46 = vadd.f32 %v398_v3, %v282_v39  ;;  %v283_v47 = vmul.f32 %v1639_v40, %v279_v35  ;;  %v1618_v38 = vld [vmem:[%s2168_s14 + $0x10] sm:$0xff]  }
 0x127   :  { %v485_v50 = vpack.c.bf16 %v470_v44, %v469_v42  ;;  %v407_v52 = vmul.f32 0.18215, %v399_v46  ;;  %v402_v53 = vadd.f32 %v401_v9, %v283_v47  ;;  %v1615_v9 = vld [vmem:[%s2167_s13 + $0x8] sm:$0xff]  }
 0x129   :  { %v443_v56 = vmul.f32 %v434_v34, %v407_v52  ;;  %v1985_v57 = vmul.f32 %v458_v54, %v407_v52  ;;  %v408_v58 = vmul.f32 0.18215, %v402_v53  ;;  %1472 = vmatprep.mubr.msk.bf16.mxu0 %vm492_vm2, %v485_v50  ;;  %1478 = vmatprep.mubr.msk.bf16.mxu1 %vm492_vm2, %v485_v50 }
 0x12b   :  { %v444_v62 = vmul.f32 %v439_v28, %v408_v58  ;;  %v1991_v63 = vmul.f32 %v463_v51, %v408_v58  ;;  %v483_v0 = vsub.f32 %v1983_v55, %v1985_v57  ;;  %v471_v1 = vadd.f32 %v467_v61, %v443_v56 }
 0x12d   :  { %v472_v2 = vadd.f32 %v468_v60, %v444_v62  ;;  %v484_v3 = vsub.f32 %v1989_v59, %v1991_v63 }
 0x12f   :  { %v486_v5 = vpack.c.bf16 %v472_v2, %v471_v1 }
 0x131   :  { %1473 = vmatmul.mubr.msk.bf16.vlgmr.msra.gmra.mrb[8].mxu0 %vm492_vm2, %v486_v5  ;;  %1479 = vmatmul.mubr.msk.bf16.vlgmr.msra.gmra.mrb[8].mxu1 %vm492_vm2, %v486_v5 }
 0x132   :  { %1483 = vmatpush3.bf16.msra.mxu0 %v1611_v4  ;;  %1486 = vmatprep.mubr.msk.bf16.mxu0 %vm1706_vm3, %v1705_v41 }
 0x133   :  { %1484 = vmatprep.subr.bf16.mxu0 %v1705_v41  ;;  %1494 = vmatprep.mubr.msk.bf16.mxu1 %vm1706_vm3, %v1705_v41 }
 0x134   :  { %1491 = vmatpush3.bf16.msra.mxu1 %v1614_v8 }
 0x135   :  { %1492 = vmatprep.subr.bf16.mxu1 %v1705_v41 }
 0x136   :  { %1485 = vmatpush3.bf16.msra.mxu0 %v1612_v6 }
 0x137   :  { %1498 = vmatprep.subr.bf16.mxu0 %v1705_v41 }
 0x138   :  { %1493 = vmatpush3.bf16.msra.mxu1 %v1615_v9 }
 0x139   :  { %1487 = vmatmul.mubr.msk.bf16.vlgmr.msra.gmra.mrb[12].mxu0 %vm632_vm4, %v1613_v7  ;;  %1504 = vmatprep.subr.bf16.mxu1 %v1705_v41 }
 0x13a   :  { %1500 = vmatprep.mubr.msk.bf16.mxu0 %vm1706_vm3, %v1705_v41 }
 0x13b   :  { %1495 = vmatmul.mubr.msk.bf16.vlgmr.msra.gmra.mrb[12].mxu1 %vm632_vm4, %v1613_v7 }
 0x13c   :  { %1506 = vmatprep.mubr.msk.bf16.mxu1 %vm1706_vm3, %v1705_v41 }
 0x204   :  { %v1480_v11 = vpop.f32.mrb[8].mxu1 }
 0x205   :  { %v594_v13 = vpop.f32.mrb[9].mxu1  ;;  %v603_v17 = vadd.f32 %v1480_v11, %v555_v10 }
 0x206   :  { %v1481_v16 = vpop.f32.mrb[10].mxu1  ;;  %v595_v20 = vadd.f32 %v594_v13, %v553_v14 }
 0x207   :  { %v606_v18 = vadd.f32 %v1481_v16, %v556_v12  ;;  %v597_v19 = vpop.f32.mrb[11].mxu1 }
 0x208   :  { %v598_v21 = vadd.f32 %v597_v19, %v554_v15 }
 0x209   :  { %v739_v22 = vpack.c.bf16 %v606_v18, %v603_v17 }
 0x20a   :  { %v738_v23 = vpack.c.bf16 %v598_v21, %v595_v20 }
 0x20c   :  { %v670_v24 = vpop.f32.mrb[12].mxu0 }
 0x20d   :  { %v677_v25 = vpack.c.bf16 %v670_v24, %v670_v24  ;;  %v1488_v26 = vpop.f32.mrb[13].mxu0 }
 0x20e   :  { %v673_v28 = vpop.f32.mrb[14].mxu0  ;;  %v729_v31 = vpop.f32.mrb[12].mxu1 }
 0x20f   :  { %v678_v29 = vpack.c.bf16 %v673_v28, %v673_v28  ;;  %v1489_v30 = vpop.f32.mrb[15].mxu0  ;;  %1499 = vmatpush3.bf16.xpose.msra.mxu0 %v677_v25  ;;  %v736_v33 = vpack.c.bf16 %v729_v31, %v729_v31  ;;  %v1496_v34 = vpop.f32.mrb[13].mxu1 }
 0x210   :  { %1510 = vmatprep.subr.bf16.mxu0 %v1705_v41  ;;  %v732_v35 = vpop.f32.mrb[14].mxu1 }
 0x211   :  { %1505 = vmatpush3.bf16.xpose.msra.mxu1 %v678_v29  ;;  %v878_v37 = vsel %vm876_vm5, %v736_v33, 0  ;;  %v737_v39 = vpack.c.bf16 %v732_v35, %v732_v35  ;;  %v1497_v40 = vpop.f32.mrb[15].mxu1  ;;  %v1619_v35 = vld [vmem:[%s2168_s14 + $0x18] sm:$0xff]  }
 0x212   :  { %1516 = vmatprep.subr.bf16.mxu1 %v1705_v41  ;;  %v1622_v40 = vld [vmem:[%s2168_s14 + $0x30] sm:$0xff]  }
 0x213   :  { %v925_v42 = vsel %vm876_vm5, %v737_v39, 0  ;;  %v1621_v39 = vld [vmem:[%s2168_s14 + $0x28] sm:$0xff]  }
 0x216   :  { %1501 = vmatmul.mubr.bf16.vlgmr.msra.gmra.mrb[16].mxu0 %v738_v23 }
 0x217   :  { %1512 = vmatprep.mubr.msk.bf16.mxu0 %vm1706_vm3, %v1705_v41  ;;  %1511 = vmatpush3.bf16.msra.mxu0 %v878_v37  ;;  %v1620_v37 = vld [vmem:[%s2168_s14 + $0x20] sm:$0xff]  }
 0x218   :  { %1507 = vmatmul.mubr.bf16.vlgmr.msra.gmra.mrb[16].mxu1 %v739_v22  ;;  %v1616_v22 = vld [vmem:[%s2168_s14] sm:$0xff]  }
 0x219   :  { %1518 = vmatprep.mubr.msk.bf16.mxu1 %vm1706_vm3, %v1705_v41  ;;  %1517 = vmatpush3.bf16.msra.mxu1 %v925_v42  ;;  %v1623_v42 = vld [vmem:[%s2168_s14 + $0x38] sm:$0xff]  }
 0x21a   :  { %1522 = vmatprep.subr.bf16.mxu0 %v1616_v22 }
 0x2e9   :  { %v774_v44 = vpop.f32.mrb[16].mxu0 }
 0x2ea   :  { %v822_v46 = vmul.f32 0.088388346, %v774_v44  ;;  %v1502_v47 = vpop.f32.mrb[17].mxu0  ;;  %v1624_v44 = vld [vmem:[%s2169_s15] sm:$0xff]  }
 0x2eb   :  { %v777_v48 = vpop.f32.mrb[18].mxu0  ;;  %v815_v49 = vpop.f32.mrb[16].mxu1  ;;  %1542 = vmatprep.subr.bf16.mxu1 %v1624_v44  ;;  %v1626_v47 = vld [vmem:[%s2169_s15 + $0x10] sm:$0xff]  }
 0x2ec   :  { %v823_v50 = vmul.f32 0.088388346, %v777_v48  ;;  %v1503_v51 = vpop.f32.mrb[19].mxu0  ;;  %v1508_v41 = vpop.f32.mrb[17].mxu1  ;;  %v824_v52 = vmul.f32 0.088388346, %v815_v49 }
 0x2ed   :  { %v818_v53 = vpop.f32.mrb[18].mxu1  ;;  %v827_v54 = vsel %vm826_vm6, %v822_v46, -inf  ;;  %v1627_v48 = vld [vmem:[%s2169_s15 + $0x18] sm:$0xff]   ;;  %v1628_v49 = vld [vmem:[%s2169_s15 + $0x20] sm:$0xff]  }
 0x2ee   :  { %828 = vmax.xlane.f32.xlu0 %v827_v54  ;;  %v1509_v56 = vpop.f32.mrb[19].mxu1  ;;  %v830_v58 = vsel %vm826_vm6, %v823_v50, -inf  ;;  %v825_v60 = vmul.f32 0.088388346, %v818_v53  ;;  %v833_v61 = vsel %vm826_vm6, %v824_v52, -inf }
 0x2ef   :  { %831 = vmax.xlane.f32.xlu1 %v830_v58 }
 0x2f0   :  { %v836_v62 = vsel %vm826_vm6, %v825_v60, -inf }
 0x2f2   :  { %834 = vmax.xlane.f32.xlu0 %v833_v61 }
 0x2f6   :  { %837 = vmax.xlane.f32.xlu0 %v836_v62 }
 0x37b   :  { %v829_v1 = vpop.xlane.xlu0 %828 }
 0x37c   :  { %v839_v2 = vsub.f32 %v822_v46, %v829_v1  ;;  %v832_v4 = vpop.xlane.xlu1 %831  ;;  %v1625_v46 = vld [vmem:[%s2169_s15 + $0x8] sm:$0xff]   ;;  %v1630_v1 = vld [vmem:[%s2169_s15 + $0x30] sm:$0xff]  }
 0x37d   :  { %v840_v5 = vsub.f32 %v823_v50, %v832_v4  ;;  %v1629_v50 = vld [vmem:[%s2169_s15 + $0x28] sm:$0xff]   ;;  %v490_v4 = vld [vmem:[%s2159_s5 + $0x10] sm:$0xff] }
 0x37e   :  { %v843_v6 = vmul.f32 1.442695, %v839_v2  ;;  %v1631_v2 = vld [vmem:[%s2169_s15 + $0x38] sm:$0xff]  }
 0x37f   :  { %v845_v7 = vmul.f32 1.442695, %v840_v5  ;;  %v835_v8 = vpop.xlane.xlu0 %834 }
 0x380   :  { %1640 = vpow2.f32 %v843_v6  ;;  %v841_v9 = vsub.f32 %v824_v52, %v835_v8  ;;  %v491_v6 = vld [vmem:[%s2159_s5 + $0x18] sm:$0xff] }
 0x381   :  { %1642 = vpow2.f32 %v845_v7  ;;  %v488_v7 = vld [vmem:[%s2159_s5] sm:$0xff] }
 0x382   :  { %v847_v10 = vmul.f32 1.442695, %v841_v9  ;;  %v489_v9 = vld [vmem:[%s2159_s5 + $0x8] sm:$0xff]  ;;  %s1707_s5 = smov [#allocation2]  }
 0x383   :  { %v838_v11 = vpop.xlane.xlu0 %837  ;;  %s1342_s15 = sshll.u32 %s1707_s5, 4  ;;  %s1343_s15 = int_to_ptr.vmem [resolvable:$true] %s1342_s15 }
 0x384   :  { %1644 = vpow2.f32 %v847_v10  ;;  %v842_v12 = vsub.f32 %v825_v60, %v838_v11  ;;  %s1656_s10 = scalar_lea.vmem %s1343_s15, 128  ;;  %p1661_p1 = scmp.lt.s32.totalorder %s1343_s15, %s1343_s15 }
 0x385   :  { %p1657_p0 = scmp.ne.s32.totalorder %s1343_s15, %s1656_s10  ;;  %p1662_p2 = scmp.lt.s32.totalorder %s1656_s10, %s1656_s10 }
 0x386   :  { %v849_v13 = vmul.f32 1.442695, %v842_v12 }
 0x387   :  { %p1663_p3 = por %p1662_p2, %p1661_p1 }
 0x388   :  { %1646 = vpow2.f32 %v849_v13 }
 0x389   :  { %p1664_p4 = pnand %p1663_p3, %p1657_p0 }
 0x38a   :  { %v1641_v14 = vpop.eup %1640 }
 0x38b   :  { %v1643_v15 = vpop.eup %1642  ;;  %v851_v16 = vsel %vm826_vm6, %v1641_v14, 0.0 }
 0x38c   :  { %852 = vadd.xlane.f32.xlu1 %v851_v16  ;;  %v854_v17 = vsel %vm826_vm6, %v1643_v15, 0.0 }
 0x38d   :  { %855 = vadd.xlane.f32.xlu0 %v854_v17 }
 0x38e   :  { %v1645_v18 = vpop.eup %1644 }
 0x38f   :  { %v857_v19 = vsel %vm826_vm6, %v1645_v18, 0.0 }
 0x390   :  { %858 = vadd.xlane.f32.xlu1 %v857_v19 }
 0x392   :  { %v1647_v20 = vpop.eup %1646 }
 0x393   :  { %v860_v21 = vsel %vm826_vm6, %v1647_v20, 0.0 }
 0x394   :  { %861 = vadd.xlane.f32.xlu0 %v860_v21 }
 0x3c1   :  { %1236 = vxpose.xlu0.b32.start [1/2] (short) (narrow) %v481_v43, 8 }
 0x3c5   :  { %1237 = vxpose.xlu0.b32.end [2/2] (short) (narrow) %v482_v45, 8 }
 0x419   :  { %v853_v23 = vpop.xlane.xlu1 %852 }
 0x41a   :  { %1648 = vrcp.f32 %v853_v23  ;;  %v856_v24 = vpop.xlane.xlu0 %855 }
 0x41b   :  { %1650 = vrcp.f32 %v856_v24 }
 0x41d   :  { %v859_v25 = vpop.xlane.xlu1 %858 }
 0x41e   :  { %1652 = vrcp.f32 %v859_v25 }
 0x421   :  { %v862_v26 = vpop.xlane.xlu0 %861 }
 0x422   :  { %1654 = vrcp.f32 %v862_v26 }
 0x424   :  { %v1649_v28 = vpop.eup %1648 }
 0x425   :  { %v1651_v29 = vpop.eup %1650  ;;  %v867_v30 = vmul.f32 %v1649_v28, %v1641_v14 }
 0x426   :  { %v868_v31 = vmul.f32 %v1651_v29, %v1643_v15 }
 0x428   :  { %v871_v33 = vpack.c.bf16 %v868_v31, %v867_v30  ;;  %v1653_v32 = vpop.eup %1652 }
 0x429   :  { %v869_v43 = vmul.f32 %v1653_v32, %v1645_v18 }
 0x42a   :  { %1513 = vmatmul.mubr.msk.bf16.vlgmr.msra.gmra.mrb[20].mxu0 %vm826_vm6, %v871_v33 }
 0x42b   :  { %1523 = vmatpush3.bf16.msra.mxu0 %v1616_v22 }
 0x42c   :  { %v1655_v36 = vpop.eup %1654  ;;  %1524 = vmatprep.subr.bf16.mxu0 %v1617_v27 }
 0x42d   :  { %v870_v45 = vmul.f32 %v1655_v36, %v1647_v20 }
 0x42f   :  { %v872_v34 = vpack.c.bf16 %v870_v45, %v869_v43  ;;  %1525 = vmatpush3.bf16.msra.mxu0 %v1617_v27 }
 0x430   :  { %1526 = vmatprep.subr.bf16.mxu0 %v1618_v38 }
 0x431   :  { %1519 = vmatmul.mubr.msk.bf16.vlgmr.msra.gmra.mrb[20].mxu1 %vm826_vm6, %v872_v34 }
 0x432   :  { %1543 = vmatpush3.bf16.msra.mxu1 %v1624_v44 }
 0x433   :  { %1527 = vmatpush3.bf16.msra.mxu0 %v1618_v38  ;;  %1544 = vmatprep.subr.bf16.mxu1 %v1625_v46 }
 0x434   :  { %1528 = vmatprep.subr.bf16.mxu0 %v1619_v35 }
 0x436   :  { %1545 = vmatpush3.bf16.msra.mxu1 %v1625_v46 }
 0x437   :  { %1529 = vmatpush3.bf16.msra.mxu0 %v1619_v35  ;;  %1546 = vmatprep.subr.bf16.mxu1 %v1626_v47 }
 0x438   :  { %1530 = vmatprep.subr.bf16.mxu0 %v1620_v37 }
 0x43a   :  { %1547 = vmatpush3.bf16.msra.mxu1 %v1626_v47 }
 0x43b   :  { %1531 = vmatpush3.bf16.msra.mxu0 %v1620_v37  ;;  %1548 = vmatprep.subr.bf16.mxu1 %v1627_v48 }
 0x43c   :  { %1532 = vmatprep.subr.bf16.mxu0 %v1621_v39 }
 0x43e   :  { %1549 = vmatpush3.bf16.msra.mxu1 %v1627_v48 }
 0x43f   :  { %1533 = vmatpush3.bf16.msra.mxu0 %v1621_v39  ;;  %1550 = vmatprep.subr.bf16.mxu1 %v1628_v49 }
 0x440   :  { %1534 = vmatprep.subr.bf16.mxu0 %v1622_v40 }
 0x441   :  { %v1252_v18 = vpop.trf.xlu0 }
 0x442   :  { %1551 = vmatpush3.bf16.msra.mxu1 %v1628_v49  ;;  %1268 = vst.msk [vmem:[#allocation4] sm:$0xf] %vm1234_vm7, %v1252_v18 }
 0x443   :  { %1535 = vmatpush3.bf16.msra.mxu0 %v1622_v40  ;;  %1552 = vmatprep.subr.bf16.mxu1 %v1629_v50 }
 0x444   :  { %1536 = vmatprep.subr.bf16.mxu0 %v1623_v42 }
 0x446   :  { %1553 = vmatpush3.bf16.msra.mxu1 %v1629_v50 }
 0x447   :  { %1537 = vmatpush3.bf16.msra.mxu0 %v1623_v42  ;;  %1554 = vmatprep.subr.bf16.mxu1 %v1630_v1 }
 0x44a   :  { %1555 = vmatpush3.bf16.msra.mxu1 %v1630_v1 }
 0x44b   :  { %1556 = vmatprep.subr.bf16.mxu1 %v1631_v2 }
 0x44e   :  { %1557 = vmatpush3.bf16.msra.mxu1 %v1631_v2 }
 0x4fd   :  { %v914_v51 = vpop.f32.mrb[20].mxu0 }
 0x4fe   :  { %v1514_v41 = vpop.f32.mrb[21].mxu0 }
 0x4ff   :  { %v917_v52 = vpop.f32.mrb[22].mxu0 }
 0x500   :  { %v968_v53 = vpack.c.bf16 %v917_v52, %v914_v51  ;;  %v1515_v54 = vpop.f32.mrb[23].mxu0 }
 0x502   :  { %1538 = vmatprep.mubr.bf16.mxu0 %v968_v53 }
 0x504   :  { %v961_v56 = vpop.f32.mrb[20].mxu1 }
 0x505   :  { %v1520_v58 = vpop.f32.mrb[21].mxu1 }
 0x506   :  { %v964_v60 = vpop.f32.mrb[22].mxu1 }
 0x507   :  { %v969_v61 = vpack.c.bf16 %v964_v60, %v961_v56  ;;  %v1521_v62 = vpop.f32.mrb[23].mxu1 }
 0x509   :  { %1539 = vmatmul.mubr.bf16.vlgmr.msra.gmra.mrb[8].mxu0 %v969_v61 }
 0x5dc   :  { %v1540_v5 = vpop.f32.mrb[8].mxu0 }
 0x5dd   :  { %v1068_v8 = vpop.f32.mrb[9].mxu0  ;;  %v1562_v11 = vadd.f32 %v1540_v5, %v490_v4 }
 0x5de   :  { %v1541_v10 = vpop.f32.mrb[10].mxu0  ;;  %v1563_v14 = vadd.f32 %v1068_v8, %v488_v7 }
 0x5df   :  { %v1564_v12 = vadd.f32 %v1541_v10, %v491_v6  ;;  %v1071_v13 = vpop.f32.mrb[11].mxu0 }
 0x5e0   :  { %v1565_v15 = vadd.f32 %v1071_v13, %v489_v9 }
 0x5e1   :  { %v1088_v16 = vpack.c.bf16 %v1564_v12, %v1562_v11 }
 0x5e2   :  { %v1087_v17 = vpack.c.bf16 %v1565_v15, %v1563_v14 }
 0x5e4   :  { %1558 = vmatprep.mubr.bf16.mxu1 %v1087_v17 }
 0x5e5   :  { %1559 = vmatmul.mubr.bf16.vlgmr.msra.gmra.mrb[24].mxu1 %v1088_v16 }
 0x6b8   :  { %v1560_v19 = vpop.f32.mrb[24].mxu1 }
 0x6b9   :  { %1269 = vxpose.xlu0.b32.start [1/2] (short) (narrow) %v1560_v19, 8  ;;  %v1187_v20 = vpop.f32.mrb[25].mxu1 }
 0x6ba   :  { %1202 = vxpose.xlu1.b32.start [1/2] (short) (narrow) %v1187_v20, 8  ;;  %v1561_v21 = vpop.f32.mrb[26].mxu1 }
 0x6bb   :  { %v1190_v22 = vpop.f32.mrb[27].mxu1 }
 0x6bd   :  { %1270 = vxpose.xlu0.b32.end [2/2] (short) (narrow) %v1561_v21, 8 }
 0x6be   :  { %1203 = vxpose.xlu1.b32.end [2/2] (short) (narrow) %v1190_v22, 8 }
 0x6c2   :  { %1303 = vxpose.xlu1.b32.start [1/2] (short) (narrow) %v483_v0, 8 }
 0x6c6   :  { %1304 = vxpose.xlu1.b32.end [2/2] (short) (narrow) %v484_v3, 8 }
 0x739   :  { %v1285_v23 = vpop.trf.xlu0 }
 0x73a   :  { %v1218_v24 = vpop.trf.xlu1  ;;  %1302 = vst.msk [vmem:[#allocation2 + $0x4] sm:$0xf] %vm1234_vm7, %v1285_v23 }
 0x73b   :  { %1235 = vst.msk [vmem:[#allocation2] sm:$0xf] %vm1234_vm7, %v1218_v24 }
 0x73c   :  { %1667 = shalt.err (!%p1664_p4)
}
 0x73d   :  { %s1668_s19 = scalar_lea.hbm %s2170_s16, 128 }
 0x73e   :  { %p1669_p5 = scmp.ne.s32.totalorder %s2170_s16, %s1668_s19  ;;  %p1672_p6 = scmp.lt.u32.totalorder %s1668_s19, %s2170_s16 }
 0x740   :  { %p1674_p7 = pnand %p1672_p6, %p1669_p5 }
 0x742   :  { %1677 = shalt.err (!%p1674_p7)
}
 0x743   :  { %s1708_s27 = smov 64   ;;  %s1709_s14 = smov 4   ;;  %v1319_v55 = vpop.trf.xlu1 }
 0x744   :  { %1348 = dma.vmem_to_hbm [thread:$0]  %s1343_s15, 128, %s2170_s16, [#allocation3], %s1708_s27, %s1708_s27, %s1709_s14   ;;  %1336 = vst.msk [vmem:[#allocation4 + $0x4] sm:$0xf] %vm1234_vm7, %v1319_v55 }
 0x745   :  { %s1710_s13 = smov [#allocation4]  }
 0x746   :  { %s1354_s29 = sshll.u32 %s1710_s13, 4  ;;  %s1355_s29 = int_to_ptr.vmem [resolvable:$true] %s1354_s29 }
 0x747   :  { %s1678_s6 = scalar_lea.vmem %s1355_s29, 128  ;;  %p1683_p9 = scmp.lt.s32.totalorder %s1355_s29, %s1355_s29 }
 0x748   :  { %p1679_p8 = scmp.ne.s32.totalorder %s1355_s29, %s1678_s6  ;;  %p1684_p10 = scmp.lt.s32.totalorder %s1678_s6, %s1678_s6 }
 0x74a   :  { %p1685_p11 = por %p1684_p10, %p1683_p9 }
 0x74c   :  { %p1686_p12 = pnand %p1685_p11, %p1679_p8 }
 0x74e   :  { %1689 = shalt.err (!%p1686_p12)
}
 0x74f   :  { %s1690_s30 = scalar_lea.hbm %s2171_s17, 128 }
 0x750   :  { %p1691_p13 = scmp.ne.s32.totalorder %s2171_s17, %s1690_s30  ;;  %p1694_p0 = scmp.lt.u32.totalorder %s1690_s30, %s2171_s17 }
 0x752   :  { %p1696_p1 = pnand %p1694_p0, %p1691_p13 }
 0x754   :  { %1699 = shalt.err (!%p1696_p1)
}
 0x755   :  { %1360 = dma.vmem_to_hbm [thread:$0]  %s1355_s29, 128, %s2171_s17, [#allocation5], %s1708_s27, %s1708_s27, %s1709_s14  }
 0x756   :  { %1700 = dma.done.wait [#allocation3], 128  }
 0x757   :  { %1701 = vsyncadd [#allocation3], 4294967168 }
 0x758   :  { %1702 = dma.done.wait [#allocation5], 128  }
 0x759   :  { %1703 = vsyncadd [#allocation5], 4294967168 }
 0x75a   :  { %1367 = vsyncpa [#allocation3], 1 }
 0x75b   :  { %1368 = vsyncpa [#allocation5], 1 }

</bundles_post_ra>
